<compile_context>
chip_gen: v6e
topology: v6e:2x2x1
jax: 0.10.0
libtpu: 0.0.40
codegen_flags: <defaults>
</compile_context>

<pallas_src>
import functools

import jax
import jax.numpy as jnp
import numpy as np
from jax.experimental import pallas as pl
from jax.experimental.pallas import tpu as pltpu


def resblock_kernel(x_ref, w1_ref, w2_ref, mask_ref, out_ref, stk_ref, *,
                    W, C, K_pad, mxu_dtype):
    # x_ref   : (C, HW)      one image (batch dim squeezed), f32
    # w*_ref  : (C, K_pad)   stacked conv weights + bias column (+zero pad),
    #                        res_scale already folded into w2, mxu_dtype
    # mask_ref: (16, HW)     f32 border-zeroing masks, rows 0..8 = taps
    # out_ref : (C, HW)      f32
    # stk_ref : (K_pad, HW)  VMEM scratch holding the stacked 9-tap operand
    HW = x_ref.shape[-1]
    K = 9 * C

    x = x_ref[...]                    # (C, HW) f32
    masks = mask_ref[...]             # (16, HW) f32

    # Once per invocation: ones row (bias contraction) + zero padding rows.
    pad = K_pad - K
    rid = jax.lax.broadcasted_iota(jnp.int32, (pad, HW), 0)
    stk_ref[pl.ds(K, pad), :] = jnp.where(rid == 0, 1.0, 0.0).astype(mxu_dtype)

    def stage_taps(a):
        # Write the 9 shifted / border-masked taps of `a` into stk_ref[0:K].
        k = 0
        for ky in range(3):
            for kx in range(3):
                oy, ox = ky - 1, kx - 1
                off = oy * W + ox
                if off == 0:
                    t = a
                else:
                    # want shifted[p] = a[p + off]; np.roll semantics => -off
                    t = pltpu.roll(a, shift=(HW - off) % HW, axis=1)
                    t = t * masks[k:k + 1]        # zero-pad at image borders
                stk_ref[pl.ds(k * C, C), :] = t.astype(mxu_dtype)
                k += 1

    # conv1 (+bias folded) + ReLU
    stage_taps(x)
    h = jnp.dot(w1_ref[...], stk_ref[...],
                preferred_element_type=jnp.float32)          # (C, HW) f32
    h = jnp.maximum(h, 0.0)

    # conv2 (+bias and res_scale folded) + residual add
    stage_taps(h)
    res = jnp.dot(w2_ref[...], stk_ref[...],
                  preferred_element_type=jnp.float32)        # (C, HW) f32
    out_ref[...] = (res + x).astype(out_ref.dtype)


def resblock_forward(x_nchw, w1, b1, w2, b2, res_scale=1.0,
                     mxu_dtype=jnp.bfloat16):
    """x_nchw: (B, C, H, W); w*: (Cout, Cin, 3, 3) PyTorch layout; b*: (C,)."""
    B, C, H, W = x_nchw.shape
    HW = H * W
    K = 9 * C
    K_pad = ((K + 1 + 7) // 8) * 8          # room for bias column, sublane-aligned

    x = x_nchw.reshape(B, C, HW).astype(jnp.float32)         # pure reshape

    def pack_weight(w, b, scale):
        # (Cout, Cin, kh, kw) -> (Cout, kh, kw, Cin) -> (Cout, 9*Cin),
        # then append bias column and zero padding; fold `scale`.
        ws = jnp.transpose(w, (0, 2, 3, 1)).reshape(C, K).astype(jnp.float32)
        wf = jnp.zeros((C, K_pad), jnp.float32)
        wf = wf.at[:, :K].set(ws * scale)
        wf = wf.at[:, K].set(b.astype(jnp.float32) * scale)
        return wf.astype(mxu_dtype)

    w1f = pack_weight(w1, b1, 1.0)
    w2f = pack_weight(w2, b2, float(res_scale))

    # Host-precomputed border masks (shared by both convs, constant index_map).
    pos = np.arange(HW)
    r_np, c_np = pos // W, pos % W
    masks_np = np.ones((16, HW), np.float32)
    offs = [(ky - 1, kx - 1) for ky in range(3) for kx in range(3)]
    for k, (oy, ox) in enumerate(offs):
        m = np.ones(HW, dtype=bool)
        if oy == -1:
            m &= (r_np >= 1)
        elif oy == 1:
            m &= (r_np <= H - 2)
        if ox == -1:
            m &= (c_np >= 1)
        elif ox == 1:
            m &= (c_np <= W - 2)
        masks_np[k] = m.astype(np.float32)
    masks = jnp.asarray(masks_np)

    kernel = functools.partial(resblock_kernel, W=W, C=C, K_pad=K_pad,
                               mxu_dtype=mxu_dtype)

    itemsize = jnp.dtype(mxu_dtype).itemsize
    flops = 2 * (2 * B * HW * C * K_pad)                     # two convs
    bytes_accessed = (2 * B * C * HW * 4                     # x in, out
                      + 2 * C * K_pad * itemsize             # weights
                      + 16 * HW * 4)                         # masks

    out = pl.pallas_call(
        kernel,
        out_shape=jax.ShapeDtypeStruct((B, C, HW), jnp.float32),
        grid_spec=pltpu.PrefetchScalarGridSpec(
            num_scalar_prefetch=0,
            grid=(B,),
            in_specs=[
                pl.BlockSpec((pl.Squeezed(), C, HW), lambda b: (b, 0, 0)),
                pl.BlockSpec((C, K_pad), lambda b: (0, 0)),
                pl.BlockSpec((C, K_pad), lambda b: (0, 0)),
                pl.BlockSpec((16, HW), lambda b: (0, 0)),
            ],
            out_specs=pl.BlockSpec((pl.Squeezed(), C, HW), lambda b: (b, 0, 0)),
            scratch_shapes=[pltpu.VMEM((K_pad, HW), mxu_dtype)],
        ),
        compiler_params=pltpu.CompilerParams(
            dimension_semantics=("parallel",)),
        cost_estimate=pl.CostEstimate(
            flops=flops, transcendentals=0, bytes_accessed=bytes_accessed),
    )(x, w1f, w2f, masks)

    return out.reshape(B, C, H, W)                           # pure reshape


def resblock_reference(x, w1, b1, w2, b2, res_scale=1.0):
    """Pure-JAX NCHW reference matching the PyTorch module."""
    dn = jax.lax.conv_dimension_numbers(x.shape, w1.shape,
                                        ('NCHW', 'OIHW', 'NCHW'))
    h = jax.lax.conv_general_dilated(x, w1, (1, 1), 'SAME',
                                     dimension_numbers=dn)
    h = h + b1.reshape(1, -1, 1, 1)
    h = jnp.maximum(h, 0.0)
    h = jax.lax.conv_general_dilated(h, w2, (1, 1), 'SAME',
                                     dimension_numbers=dn)
    h = h + b2.reshape(1, -1, 1, 1)
    return h * res_scale + x


if __name__ == "__main__":
    B, n_feats, H, W = 2, 8, 16, 16
    ksize = 3
    res_scale = 1.0

    key = jax.random.PRNGKey(0)
    kx, kw1, kb1, kw2, kb2 = jax.random.split(key, 5)

    x = jax.random.normal(kx, (B, n_feats, H, W), dtype=jnp.float32)
    fan_in = n_feats * ksize * ksize
    bound = 1.0 / np.sqrt(fan_in)
    w1 = jax.random.uniform(kw1, (n_feats, n_feats, ksize, ksize),
                            jnp.float32, -bound, bound)
    b1 = jax.random.uniform(kb1, (n_feats,), jnp.float32, -bound, bound)
    w2 = jax.random.uniform(kw2, (n_feats, n_feats, ksize, ksize),
                            jnp.float32, -bound, bound)
    b2 = jax.random.uniform(kb2, (n_feats,), jnp.float32, -bound, bound)

    ref = jax.block_until_ready(
        resblock_reference(x, w1, b1, w2, b2, res_scale))

    # Strict validation path (f32 MXU operands, default TPU matmul precision).
    out_f32 = jax.block_until_ready(
        resblock_forward(x, w1, b1, w2, b2, res_scale,
                         mxu_dtype=jnp.float32))
    assert out_f32.shape == (B, n_feats, H, W)
    np.testing.assert_allclose(np.asarray(out_f32), np.asarray(ref),
                               rtol=1e-4, atol=1e-4)

    # Production path: bf16 MXU operands (single-pass MXU rate); tolerance
    # matches bf16 matmul precision, all elementwise math stays f32.
    out_bf16 = jax.block_until_ready(
        resblock_forward(x, w1, b1, w2, b2, res_scale,
                         mxu_dtype=jnp.bfloat16))
    assert out_bf16.shape == (B, n_feats, H, W)
    np.testing.assert_allclose(np.asarray(out_bf16), np.asarray(ref),
                               rtol=3e-2, atol=3e-2)

    print("KERNEL_OK")
</pallas_src>

<mosaic_0001>
module attributes {stable_mosaic.version = 11 : i64} {
  func.func @resblock_kernel(%arg0: i32, %arg1: memref<1x8x256xf32, #tpu.memory_space<vmem>>, %arg2: memref<8x80xf32, #tpu.memory_space<vmem>>, %arg3: memref<8x80xf32, #tpu.memory_space<vmem>>, %arg4: memref<16x256xf32, #tpu.memory_space<vmem>>, %arg5: memref<1x8x256xf32, #tpu.memory_space<vmem>>, %arg6: memref<80x256xf32, #tpu.memory_space<vmem>>) attributes {dimension_semantics = [#tpu.dimension_semantics<parallel>], iteration_bounds = array<i64: 2>, scalar_prefetch = 0 : i64, scratch_operands = 1 : i64, tpu.core_type = #tpu.core_type<tc>, window_params = [{transform_indices = @transform_0, window_bounds = array<i64: 1, 8, 256>}, {pipeline_mode = #tpu.pipeline_mode<synchronous>, transform_indices = @transform_1, window_bounds = array<i64: 8, 80>}, {pipeline_mode = #tpu.pipeline_mode<synchronous>, transform_indices = @transform_2, window_bounds = array<i64: 8, 80>}, {pipeline_mode = #tpu.pipeline_mode<synchronous>, transform_indices = @transform_3, window_bounds = array<i64: 16, 256>}, {transform_indices = @transform_4, window_bounds = array<i64: 1, 8, 256>}]} {
    %c0 = arith.constant 0 : index
    %c0_0 = arith.constant 0 : index
    %c0_1 = arith.constant 0 : index
    %0 = vector.load %arg1[%c0, %c0_0, %c0_1] : memref<1x8x256xf32, #tpu.memory_space<vmem>>, vector<1x8x256xf32>
    %1 = vector.shape_cast %0 : vector<1x8x256xf32> to vector<8x256xf32>
    %c0_2 = arith.constant 0 : index
    %c0_3 = arith.constant 0 : index
    %2 = vector.load %arg4[%c0_2, %c0_3] : memref<16x256xf32, #tpu.memory_space<vmem>>, vector<16x256xf32>
    %3 = tpu.iota {dimensions = array<i32: 0>} : vector<8x256xi32>
    %c0_i32 = arith.constant 0 : i32
    %4 = vector.broadcast %c0_i32 : i32 to vector<8x256xi32>
    %5 = arith.cmpi eq, %3, %4 : vector<8x256xi32>
    %cst = arith.constant 1.000000e+00 : f32
    %cst_4 = arith.constant 0.000000e+00 : f32
    %6 = vector.broadcast %cst : f32 to vector<8x256xf32>
    %7 = vector.broadcast %cst_4 : f32 to vector<8x256xf32>
    %8 = arith.select %5, %6, %7 : vector<8x256xi1>, vector<8x256xf32>
    %c72 = arith.constant 72 : index
    %c0_5 = arith.constant 0 : index
    %9 = vector.load %arg6[%c72, %c0_5] : memref<80x256xf32, #tpu.memory_space<vmem>>, vector<8x256xf32>
    tpu.vector_store %arg6[%c72, %c0_5], %8 {strides = array<i32>} : memref<80x256xf32, #tpu.memory_space<vmem>>, vector<8x256xf32>,
    %c17_i32 = arith.constant 17 : i32
    %10 = tpu.dynamic_rotate %1 by %c17_i32 dim 1 : vector<8x256xf32>, i32 -> vector<8x256xf32>
    %11 = vector.extract_strided_slice %2 {offsets = [0, 0], sizes = [1, 256], strides = [1, 1]} : vector<16x256xf32> to vector<1x256xf32>
    %12 = vector.broadcast %11 : vector<1x256xf32> to vector<8x256xf32>
    %13 = arith.mulf %10, %12 : vector<8x256xf32>
    %c0_6 = arith.constant 0 : index
    %c0_7 = arith.constant 0 : index
    %14 = vector.load %arg6[%c0_6, %c0_7] : memref<80x256xf32, #tpu.memory_space<vmem>>, vector<8x256xf32>
    tpu.vector_store %arg6[%c0_6, %c0_7], %13 {strides = array<i32>} : memref<80x256xf32, #tpu.memory_space<vmem>>, vector<8x256xf32>,
    %c16_i32 = arith.constant 16 : i32
    %15 = tpu.dynamic_rotate %1 by %c16_i32 dim 1 : vector<8x256xf32>, i32 -> vector<8x256xf32>
    %16 = vector.extract_strided_slice %2 {offsets = [1, 0], sizes = [1, 256], strides = [1, 1]} : vector<16x256xf32> to vector<1x256xf32>
    %17 = vector.broadcast %16 : vector<1x256xf32> to vector<8x256xf32>
    %18 = arith.mulf %15, %17 : vector<8x256xf32>
    %c8 = arith.constant 8 : index
    %c0_8 = arith.constant 0 : index
    %19 = vector.load %arg6[%c8, %c0_8] : memref<80x256xf32, #tpu.memory_space<vmem>>, vector<8x256xf32>
    tpu.vector_store %arg6[%c8, %c0_8], %18 {strides = array<i32>} : memref<80x256xf32, #tpu.memory_space<vmem>>, vector<8x256xf32>,
    %c15_i32 = arith.constant 15 : i32
    %20 = tpu.dynamic_rotate %1 by %c15_i32 dim 1 : vector<8x256xf32>, i32 -> vector<8x256xf32>
    %21 = vector.extract_strided_slice %2 {offsets = [2, 0], sizes = [1, 256], strides = [1, 1]} : vector<16x256xf32> to vector<1x256xf32>
    %22 = vector.broadcast %21 : vector<1x256xf32> to vector<8x256xf32>
    %23 = arith.mulf %20, %22 : vector<8x256xf32>
    %c16 = arith.constant 16 : index
    %c0_9 = arith.constant 0 : index
    %24 = vector.load %arg6[%c16, %c0_9] : memref<80x256xf32, #tpu.memory_space<vmem>>, vector<8x256xf32>
    tpu.vector_store %arg6[%c16, %c0_9], %23 {strides = array<i32>} : memref<80x256xf32, #tpu.memory_space<vmem>>, vector<8x256xf32>,
    %c1_i32 = arith.constant 1 : i32
    %25 = tpu.dynamic_rotate %1 by %c1_i32 dim 1 : vector<8x256xf32>, i32 -> vector<8x256xf32>
    %26 = vector.extract_strided_slice %2 {offsets = [3, 0], sizes = [1, 256], strides = [1, 1]} : vector<16x256xf32> to vector<1x256xf32>
    %27 = vector.broadcast %26 : vector<1x256xf32> to vector<8x256xf32>
    %28 = arith.mulf %25, %27 : vector<8x256xf32>
    %c24 = arith.constant 24 : index
    %c0_10 = arith.constant 0 : index
    %29 = vector.load %arg6[%c24, %c0_10] : memref<80x256xf32, #tpu.memory_space<vmem>>, vector<8x256xf32>
    tpu.vector_store %arg6[%c24, %c0_10], %28 {strides = array<i32>} : memref<80x256xf32, #tpu.memory_space<vmem>>, vector<8x256xf32>,
    %c32 = arith.constant 32 : index
    %c0_11 = arith.constant 0 : index
    %30 = vector.load %arg6[%c32, %c0_11] : memref<80x256xf32, #tpu.memory_space<vmem>>, vector<8x256xf32>
    tpu.vector_store %arg6[%c32, %c0_11], %1 {strides = array<i32>} : memref<80x256xf32, #tpu.memory_space<vmem>>, vector<8x256xf32>,
    %c255_i32 = arith.constant 255 : i32
    %31 = tpu.dynamic_rotate %1 by %c255_i32 dim 1 : vector<8x256xf32>, i32 -> vector<8x256xf32>
    %32 = vector.extract_strided_slice %2 {offsets = [5, 0], sizes = [1, 256], strides = [1, 1]} : vector<16x256xf32> to vector<1x256xf32>
    %33 = vector.broadcast %32 : vector<1x256xf32> to vector<8x256xf32>
    %34 = arith.mulf %31, %33 : vector<8x256xf32>
    %c40 = arith.constant 40 : index
    %c0_12 = arith.constant 0 : index
    %35 = vector.load %arg6[%c40, %c0_12] : memref<80x256xf32, #tpu.memory_space<vmem>>, vector<8x256xf32>
    tpu.vector_store %arg6[%c40, %c0_12], %34 {strides = array<i32>} : memref<80x256xf32, #tpu.memory_space<vmem>>, vector<8x256xf32>,
    %c241_i32 = arith.constant 241 : i32
    %36 = tpu.dynamic_rotate %1 by %c241_i32 dim 1 : vector<8x256xf32>, i32 -> vector<8x256xf32>
    %37 = vector.extract_strided_slice %2 {offsets = [6, 0], sizes = [1, 256], strides = [1, 1]} : vector<16x256xf32> to vector<1x256xf32>
    %38 = vector.broadcast %37 : vector<1x256xf32> to vector<8x256xf32>
    %39 = arith.mulf %36, %38 : vector<8x256xf32>
    %c48 = arith.constant 48 : index
    %c0_13 = arith.constant 0 : index
    %40 = vector.load %arg6[%c48, %c0_13] : memref<80x256xf32, #tpu.memory_space<vmem>>, vector<8x256xf32>
    tpu.vector_store %arg6[%c48, %c0_13], %39 {strides = array<i32>} : memref<80x256xf32, #tpu.memory_space<vmem>>, vector<8x256xf32>,
    %c240_i32 = arith.constant 240 : i32
    %41 = tpu.dynamic_rotate %1 by %c240_i32 dim 1 : vector<8x256xf32>, i32 -> vector<8x256xf32>
    %42 = vector.extract_strided_slice %2 {offsets = [7, 0], sizes = [1, 256], strides = [1, 1]} : vector<16x256xf32> to vector<1x256xf32>
    %43 = vector.broadcast %42 : vector<1x256xf32> to vector<8x256xf32>
    %44 = arith.mulf %41, %43 : vector<8x256xf32>
    %c56 = arith.constant 56 : index
    %c0_14 = arith.constant 0 : index
    %45 = vector.load %arg6[%c56, %c0_14] : memref<80x256xf32, #tpu.memory_space<vmem>>, vector<8x256xf32>
    tpu.vector_store %arg6[%c56, %c0_14], %44 {strides = array<i32>} : memref<80x256xf32, #tpu.memory_space<vmem>>, vector<8x256xf32>,
    %c239_i32 = arith.constant 239 : i32
    %46 = tpu.dynamic_rotate %1 by %c239_i32 dim 1 : vector<8x256xf32>, i32 -> vector<8x256xf32>
    %47 = vector.extract_strided_slice %2 {offsets = [8, 0], sizes = [1, 256], strides = [1, 1]} : vector<16x256xf32> to vector<1x256xf32>
    %48 = vector.broadcast %47 : vector<1x256xf32> to vector<8x256xf32>
    %49 = arith.mulf %46, %48 : vector<8x256xf32>
    %c64 = arith.constant 64 : index
    %c0_15 = arith.constant 0 : index
    %50 = vector.load %arg6[%c64, %c0_15] : memref<80x256xf32, #tpu.memory_space<vmem>>, vector<8x256xf32>
    tpu.vector_store %arg6[%c64, %c0_15], %49 {strides = array<i32>} : memref<80x256xf32, #tpu.memory_space<vmem>>, vector<8x256xf32>,
    %c0_16 = arith.constant 0 : index
    %c0_17 = arith.constant 0 : index
    %51 = vector.load %arg2[%c0_16, %c0_17] : memref<8x80xf32, #tpu.memory_space<vmem>>, vector<8x80xf32>
    %c0_18 = arith.constant 0 : index
    %c0_19 = arith.constant 0 : index
    %52 = vector.load %arg6[%c0_18, %c0_19] : memref<80x256xf32, #tpu.memory_space<vmem>>, vector<80x256xf32>
    %cst_20 = arith.constant dense<0.000000e+00> : vector<8x256xf32>
    %53 = tpu.matmul %51, %52, %cst_20 {dimension_numbers = #tpu.dot_dimension_numbers<[1], [0], [0], [1], [0, 0, 1, 1], [], []>} : vector<8x80xf32>, vector<80x256xf32>, vector<8x256xf32> -> vector<8x256xf32>
    %cst_21 = arith.constant 0.000000e+00 : f32
    %54 = vector.broadcast %cst_21 : f32 to vector<8x256xf32>
    %55 = arith.maximumf %53, %54 : vector<8x256xf32>
    %c17_i32_22 = arith.constant 17 : i32
    %56 = tpu.dynamic_rotate %55 by %c17_i32_22 dim 1 : vector<8x256xf32>, i32 -> vector<8x256xf32>
    %57 = vector.extract_strided_slice %2 {offsets = [0, 0], sizes = [1, 256], strides = [1, 1]} : vector<16x256xf32> to vector<1x256xf32>
    %58 = vector.broadcast %57 : vector<1x256xf32> to vector<8x256xf32>
    %59 = arith.mulf %56, %58 : vector<8x256xf32>
    %c0_23 = arith.constant 0 : index
    %c0_24 = arith.constant 0 : index
    %60 = vector.load %arg6[%c0_23, %c0_24] : memref<80x256xf32, #tpu.memory_space<vmem>>, vector<8x256xf32>
    tpu.vector_store %arg6[%c0_23, %c0_24], %59 {strides = array<i32>} : memref<80x256xf32, #tpu.memory_space<vmem>>, vector<8x256xf32>,
    %c16_i32_25 = arith.constant 16 : i32
    %61 = tpu.dynamic_rotate %55 by %c16_i32_25 dim 1 : vector<8x256xf32>, i32 -> vector<8x256xf32>
    %62 = vector.extract_strided_slice %2 {offsets = [1, 0], sizes = [1, 256], strides = [1, 1]} : vector<16x256xf32> to vector<1x256xf32>
    %63 = vector.broadcast %62 : vector<1x256xf32> to vector<8x256xf32>
    %64 = arith.mulf %61, %63 : vector<8x256xf32>
    %c8_26 = arith.constant 8 : index
    %c0_27 = arith.constant 0 : index
    %65 = vector.load %arg6[%c8_26, %c0_27] : memref<80x256xf32, #tpu.memory_space<vmem>>, vector<8x256xf32>
    tpu.vector_store %arg6[%c8_26, %c0_27], %64 {strides = array<i32>} : memref<80x256xf32, #tpu.memory_space<vmem>>, vector<8x256xf32>,
    %c15_i32_28 = arith.constant 15 : i32
    %66 = tpu.dynamic_rotate %55 by %c15_i32_28 dim 1 : vector<8x256xf32>, i32 -> vector<8x256xf32>
    %67 = vector.extract_strided_slice %2 {offsets = [2, 0], sizes = [1, 256], strides = [1, 1]} : vector<16x256xf32> to vector<1x256xf32>
    %68 = vector.broadcast %67 : vector<1x256xf32> to vector<8x256xf32>
    %69 = arith.mulf %66, %68 : vector<8x256xf32>
    %c16_29 = arith.constant 16 : index
    %c0_30 = arith.constant 0 : index
    %70 = vector.load %arg6[%c16_29, %c0_30] : memref<80x256xf32, #tpu.memory_space<vmem>>, vector<8x256xf32>
    tpu.vector_store %arg6[%c16_29, %c0_30], %69 {strides = array<i32>} : memref<80x256xf32, #tpu.memory_space<vmem>>, vector<8x256xf32>,
    %c1_i32_31 = arith.constant 1 : i32
    %71 = tpu.dynamic_rotate %55 by %c1_i32_31 dim 1 : vector<8x256xf32>, i32 -> vector<8x256xf32>
    %72 = vector.extract_strided_slice %2 {offsets = [3, 0], sizes = [1, 256], strides = [1, 1]} : vector<16x256xf32> to vector<1x256xf32>
    %73 = vector.broadcast %72 : vector<1x256xf32> to vector<8x256xf32>
    %74 = arith.mulf %71, %73 : vector<8x256xf32>
    %c24_32 = arith.constant 24 : index
    %c0_33 = arith.constant 0 : index
    %75 = vector.load %arg6[%c24_32, %c0_33] : memref<80x256xf32, #tpu.memory_space<vmem>>, vector<8x256xf32>
    tpu.vector_store %arg6[%c24_32, %c0_33], %74 {strides = array<i32>} : memref<80x256xf32, #tpu.memory_space<vmem>>, vector<8x256xf32>,
    %c32_34 = arith.constant 32 : index
    %c0_35 = arith.constant 0 : index
    %76 = vector.load %arg6[%c32_34, %c0_35] : memref<80x256xf32, #tpu.memory_space<vmem>>, vector<8x256xf32>
    tpu.vector_store %arg6[%c32_34, %c0_35], %55 {strides = array<i32>} : memref<80x256xf32, #tpu.memory_space<vmem>>, vector<8x256xf32>,
    %c255_i32_36 = arith.constant 255 : i32
    %77 = tpu.dynamic_rotate %55 by %c255_i32_36 dim 1 : vector<8x256xf32>, i32 -> vector<8x256xf32>
    %78 = vector.extract_strided_slice %2 {offsets = [5, 0], sizes = [1, 256], strides = [1, 1]} : vector<16x256xf32> to vector<1x256xf32>
    %79 = vector.broadcast %78 : vector<1x256xf32> to vector<8x256xf32>
    %80 = arith.mulf %77, %79 : vector<8x256xf32>
    %c40_37 = arith.constant 40 : index
    %c0_38 = arith.constant 0 : index
    %81 = vector.load %arg6[%c40_37, %c0_38] : memref<80x256xf32, #tpu.memory_space<vmem>>, vector<8x256xf32>
    tpu.vector_store %arg6[%c40_37, %c0_38], %80 {strides = array<i32>} : memref<80x256xf32, #tpu.memory_space<vmem>>, vector<8x256xf32>,
    %c241_i32_39 = arith.constant 241 : i32
    %82 = tpu.dynamic_rotate %55 by %c241_i32_39 dim 1 : vector<8x256xf32>, i32 -> vector<8x256xf32>
    %83 = vector.extract_strided_slice %2 {offsets = [6, 0], sizes = [1, 256], strides = [1, 1]} : vector<16x256xf32> to vector<1x256xf32>
    %84 = vector.broadcast %83 : vector<1x256xf32> to vector<8x256xf32>
    %85 = arith.mulf %82, %84 : vector<8x256xf32>
    %c48_40 = arith.constant 48 : index
    %c0_41 = arith.constant 0 : index
    %86 = vector.load %arg6[%c48_40, %c0_41] : memref<80x256xf32, #tpu.memory_space<vmem>>, vector<8x256xf32>
    tpu.vector_store %arg6[%c48_40, %c0_41], %85 {strides = array<i32>} : memref<80x256xf32, #tpu.memory_space<vmem>>, vector<8x256xf32>,
    %c240_i32_42 = arith.constant 240 : i32
    %87 = tpu.dynamic_rotate %55 by %c240_i32_42 dim 1 : vector<8x256xf32>, i32 -> vector<8x256xf32>
    %88 = vector.extract_strided_slice %2 {offsets = [7, 0], sizes = [1, 256], strides = [1, 1]} : vector<16x256xf32> to vector<1x256xf32>
    %89 = vector.broadcast %88 : vector<1x256xf32> to vector<8x256xf32>
    %90 = arith.mulf %87, %89 : vector<8x256xf32>
    %c56_43 = arith.constant 56 : index
    %c0_44 = arith.constant 0 : index
    %91 = vector.load %arg6[%c56_43, %c0_44] : memref<80x256xf32, #tpu.memory_space<vmem>>, vector<8x256xf32>
    tpu.vector_store %arg6[%c56_43, %c0_44], %90 {strides = array<i32>} : memref<80x256xf32, #tpu.memory_space<vmem>>, vector<8x256xf32>,
    %c239_i32_45 = arith.constant 239 : i32
    %92 = tpu.dynamic_rotate %55 by %c239_i32_45 dim 1 : vector<8x256xf32>, i32 -> vector<8x256xf32>
    %93 = vector.extract_strided_slice %2 {offsets = [8, 0], sizes = [1, 256], strides = [1, 1]} : vector<16x256xf32> to vector<1x256xf32>
    %94 = vector.broadcast %93 : vector<1x256xf32> to vector<8x256xf32>
    %95 = arith.mulf %92, %94 : vector<8x256xf32>
    %c64_46 = arith.constant 64 : index
    %c0_47 = arith.constant 0 : index
    %96 = vector.load %arg6[%c64_46, %c0_47] : memref<80x256xf32, #tpu.memory_space<vmem>>, vector<8x256xf32>
    tpu.vector_store %arg6[%c64_46, %c0_47], %95 {strides = array<i32>} : memref<80x256xf32, #tpu.memory_space<vmem>>, vector<8x256xf32>,
    %c0_48 = arith.constant 0 : index
    %c0_49 = arith.constant 0 : index
    %97 = vector.load %arg3[%c0_48, %c0_49] : memref<8x80xf32, #tpu.memory_space<vmem>>, vector<8x80xf32>
    %c0_50 = arith.constant 0 : index
    %c0_51 = arith.constant 0 : index
    %98 = vector.load %arg6[%c0_50, %c0_51] : memref<80x256xf32, #tpu.memory_space<vmem>>, vector<80x256xf32>
    %cst_52 = arith.constant dense<0.000000e+00> : vector<8x256xf32>
    %99 = tpu.matmul %97, %98, %cst_52 {dimension_numbers = #tpu.dot_dimension_numbers<[1], [0], [0], [1], [0, 0, 1, 1], [], []>} : vector<8x80xf32>, vector<80x256xf32>, vector<8x256xf32> -> vector<8x256xf32>
    %100 = arith.addf %99, %1 : vector<8x256xf32>
    %c0_53 = arith.constant 0 : index
    %c0_54 = arith.constant 0 : index
    %c0_55 = arith.constant 0 : index
    %101 = vector.load %arg5[%c0_53, %c0_54, %c0_55] : memref<1x8x256xf32, #tpu.memory_space<vmem>>, vector<1x8x256xf32>
    %102 = vector.shape_cast %101 : vector<1x8x256xf32> to vector<8x256xf32>
    %103 = vector.shape_cast %100 : vector<8x256xf32> to vector<1x8x256xf32>
    tpu.vector_store %arg5[%c0_53, %c0_54, %c0_55], %103 {strides = array<i32>} : memref<1x8x256xf32, #tpu.memory_space<vmem>>, vector<1x8x256xf32>,
    return
  }
  func.func @transform_0(%arg0: i32) -> (i32, i32, i32) {
    %c0_i32 = arith.constant 0 : i32
    %c0_i32_0 = arith.constant 0 : i32
    %c0_i32_1 = arith.constant 0 : i32
    return %arg0, %c0_i32, %c0_i32_0 : i32, i32, i32
  }
  func.func @transform_1(%arg0: i32) -> (i32, i32) {
    %c0_i32 = arith.constant 0 : i32
    %c0_i32_0 = arith.constant 0 : i32
    %c0_i32_1 = arith.constant 0 : i32
    return %c0_i32, %c0_i32_0 : i32, i32
  }
  func.func @transform_2(%arg0: i32) -> (i32, i32) {
    %c0_i32 = arith.constant 0 : i32
    %c0_i32_0 = arith.constant 0 : i32
    %c0_i32_1 = arith.constant 0 : i32
    return %c0_i32, %c0_i32_0 : i32, i32
  }
  func.func @transform_3(%arg0: i32) -> (i32, i32) {
    %c0_i32 = arith.constant 0 : i32
    %c0_i32_0 = arith.constant 0 : i32
    %c0_i32_1 = arith.constant 0 : i32
    return %c0_i32, %c0_i32_0 : i32, i32
  }
  func.func @transform_4(%arg0: i32) -> (i32, i32, i32) {
    %c0_i32 = arith.constant 0 : i32
    %c0_i32_0 = arith.constant 0 : i32
    %c0_i32_1 = arith.constant 0 : i32
    return %arg0, %c0_i32, %c0_i32_0 : i32, i32, i32
  }
}

</mosaic_0001>

<bundles_post_ra>
// kernel: tpu_custom_call.1
= control target key start
LH: loop header
LB: loop body
LE: loop exit
PB: predicated region body
PF: predicated region fallthrough
CT: control target
= control target key end

     0   :  { %9 = vsyncpa [#allocation4], 0  ;;  %s1570_s0 = inlined_call_operand.hbm [shape: f32[2,8,256], index: 0, kind: input, shape index: {}]   ;;  %s1571_s1 = inlined_call_operand.hbm [shape: f32[8,80], index: 1, kind: input, shape index: {}]   ;;  %s1572_s2 = inlined_call_operand.hbm [shape: f32[8,80], index: 2, kind: input, shape index: {}]   ;;  %s1573_s3 = inlined_call_operand.hbm [shape: f32[16,256], index: 3, kind: input, shape index: {}]   ;;  %s1574_s4 = inlined_call_operand.hbm [shape: f32[2,8,256], index: 4, kind: output, shape index: {}]  }
   0x1   :  { %11 = vsyncpa [#allocation4 + $0x1], 0 }
   0x2   :  { %12 = vsyncpa [#allocation7], 0 }
   0x3   :  { %13 = vsyncpa [#allocation10], 0 }
   0x4   :  { %14 = vsyncpa [#allocation5], 0 }
   0x5   :  { %16 = vsyncpa [#allocation5 + $0x1], 0  ;;  %s1152_s15 = smov 0   ;;  %s1154_s16 = smov 0  }
   0x6   :  { %s1156_s17 = smov 0   ;;  %s1158_s18 = smov 0  }
   0x7 LB: > { %s1173_s19 = sadd.s32 4294967295, %s1108_s18   ;;  %s813_s20 = sadd.s32 4294967294, %s1108_s18   ;;  %s1108_s18 = sphi %s1158_s18, %s1598_s18   ;;  %s1104_s17 = sphi %s1156_s17, %s1597_s17   ;;  %s1100_s16 = sphi %s1154_s16, %s1596_s16   ;;  %s1096_s15 = sphi %s1152_s15, %s1595_s15  }
   0x8   : > { %p42_p0 = scmp.ne.s32.totalorder %s1100_s16, %s1096_s15  ;;  %p1575_p1 = scmp.eq.s32.totalorder %s1173_s19, 0 }
   0x9   : > { %p135_p3 = scmp.eq.s32.totalorder %s813_s20, 1  ;;  %p814_p5 = scmp.ge.s32.totalorder %s1108_s18, 1 }
   0xa   : > { %p1182_p4 = por %p1575_p1, %p42_p0  ;;  %p142_p7 = scmp.lt.s32.totalorder %s1108_s18, 3 }
   0xb   : > { %p1187_p6 = por %p135_p3, %p42_p0  ;;  %s1110_s24 = smov [#allocation6]  }
   0xc   : > { %s1579_s21 = scalar_select %p1182_p4, 1, 0 }
   0xd   : > { %s1580_s22 = scalar_select %p1187_p6, 1, 0 }
   0xe   : > { %p1192_p8 = pnand %p814_p5, %p142_p7  ;;  %s155_s25 = sshll.u32 %s1110_s24, 4  ;;  %s156_s25 = int_to_ptr.vmem [resolvable:$true] %s155_s25 }
   0xf   : > { %s1111_s26 = smov [#allocation8]   ;;  %s1112_s29 = smov [#allocation9]  }
  0x10   : > { %s1581_s23 = scalar_select %p1192_p8, 1, 0 }
  0x11   : > { %p857_p10 = pneg %p1192_p8  ;;  %s166_s27 = sshll.u32 %s1111_s26, 4  ;;  %s167_s27 = int_to_ptr.vmem [resolvable:$true] %s166_s27 }
  0x12   : > { %s176_s30 = sshll.u32 %s1112_s29, 4  ;;  %s941_s5 = scalar_lea.vmem %s156_s25, 128  ;;  %s1205_s30 = int_to_ptr.vmem [resolvable:$true] %s176_s30 }
  0x13   : > { %p1201_p11 = pnand %p857_p10, %p1575_p1  ;;  %p942_p13 = scmp.ne.s32.totalorder %s156_s25, %s941_s5 }
  0x14   : > { %p949_p5 = scmp.lt.s32.totalorder %s156_s25, %s156_s25  ;;  %p950_p7 = scmp.lt.s32.totalorder %s941_s5, %s941_s5 }
  0x15   : > { %p932_p12 = pneg %p1201_p11 }
  0x16   : > { %p951_p10 = por %p950_p7, %p949_p5 }
  0x17   : > { %p944_p0 = pnand %p942_p13, %p932_p12 }
  0x19   : > { %p945_p3 = pneg %p944_p0 }
  0x1b   : > { %p952_p9 = pnand %p951_p10, %p945_p3 }
  0x1d   : > { %955 = shalt.err (!%p952_p9)
}
  0x1e   : > { %860 = dma.hbm_to_vmem [thread:$0]  (!%p1201_p11), %s1571_s1, 128, %s156_s25, [#allocation7]  }
  0x1f   : > { %s967_s8 = scalar_lea.vmem %s167_s27, 128  ;;  %p975_p13 = scmp.lt.s32.totalorder %s167_s27, %s167_s27 }
  0x20   : > { %p968_p1 = scmp.ne.s32.totalorder %s167_s27, %s967_s8  ;;  %p976_p0 = scmp.lt.s32.totalorder %s967_s8, %s967_s8 }
  0x22   : > { %p970_p2 = pnand %p968_p1, %p932_p12  ;;  %p977_p4 = por %p976_p0, %p975_p13 }
  0x24   : > { %p971_p6 = pneg %p970_p2 }
  0x26   : > { %p978_p8 = pnand %p977_p4, %p971_p6 }
  0x28   : > { %981 = shalt.err (!%p978_p8)
}
  0x29   : > { %863 = dma.hbm_to_vmem [thread:$0]  (!%p1201_p11), %s1572_s2, 128, %s167_s27, [#allocation7]  }
  0x2a   : > { %s993_s11 = scalar_lea.vmem %s1205_s30, 512  ;;  %p1001_p3 = scmp.lt.s32.totalorder %s1205_s30, %s1205_s30 }
  0x2b   : > { %p994_p9 = scmp.ne.s32.totalorder %s1205_s30, %s993_s11  ;;  %p1002_p4 = scmp.lt.s32.totalorder %s993_s11, %s993_s11 }
  0x2d   : > { %p996_p1 = pnand %p994_p9, %p932_p12  ;;  %p1003_p6 = por %p1002_p4, %p1001_p3 }
  0x2f   : > { %p997_p2 = pneg %p996_p1 }
  0x31   : > { %p1004_p8 = pnand %p1003_p6, %p997_p2 }
  0x33   : > { %1007 = shalt.err (!%p1004_p8)
}
  0x34   : > { %s1113_s12 = smov 256   ;;  %s1114_s13 = smov 16  }
  0x35   : > { %866 = dma.hbm_to_vmem [thread:$0]  (!%p1201_p11), %s1573_s3, 512, %s1205_s30, [#allocation10], %s1113_s12, %s1113_s12, %s1114_s13  }
  0x36   : > { %s1239_s24 = sadd.s32 1, %s1108_s18   ;;  %s29_s26 = sadd.s32 1, %s1104_s17 }
  0x37   : > { %s26_s25 = ssub.s32 %s1108_s18, %s1239_s24  ;;  %p36_p5 = scmp.ne.s32.totalorder %s1104_s17, %s1100_s16 }
  0x38   : > { %p27_p12 = scmp.eq.s32.totalorder %s26_s25, 0  ;;  %p37_p7 = scmp.eq.s32.totalorder %s1108_s18, 0 }
  0x39   : > { %p878_p10 = scmp.lt.s32.totalorder %s1108_s18, 2  ;;  %p1583_p0 = scmp.eq.s32.totalorder %s1173_s19, 1 }
  0x3a   : > { %s1249_s27 = scalar_select %p27_p12, %s1104_s17, %s29_s26  }
  0x3b   : > { %p38_p13 = por %p37_p7, %p36_p5  ;;  %p1253_p9 = por %p1583_p0, %p36_p5 }
  0x3c   : > { %s190_s28 = sand.u32 1, %s1104_s17   ;;  %s835_s5 = sshll.u32 %s1108_s18, 8 }
  0x3d   : > { %s1584_s29 = scalar_select %p1253_p9, 1, 0 }
  0x3e   : > { %s819_s30 = sshll.u32 %s190_s28, 4  ;;  %s1262_s8 = scalar_lea.hbm %s1570_s0, %s835_s5 }
  0x3f   : > { %s194_s9 = scalar_lea.vmem [#allocation3], %s819_s30  ;;  %p1264_p11 = pnand %p878_p10, %p38_p13 }
  0x40   : > { %s202_s10 = sshll.u32 %s194_s9, 4  ;;  %s191_s12 = scalar_lea.sflag [#allocation4], %s190_s28  ;;  %s203_s10 = int_to_ptr.vmem [resolvable:$true] %s202_s10 }
  0x41   : > { %s1008_s13 = scalar_lea.hbm %s1262_s8, 256  ;;  %p1010_p2 = pneg %p1264_p11 }
  0x42   : > { %p1009_p1 = scmp.ne.s32.totalorder %s1262_s8, %s1008_s13  ;;  %s1013_s25 = scalar_lea.hbm %s1570_s0, 512 }
  0x43   : > { %p1014_p6 = scmp.lt.s32.totalorder %s1262_s8, %s1570_s0  ;;  %p1015_p8 = scmp.lt.s32.totalorder %s1013_s25, %s1008_s13 }
  0x44   : > { %p1011_p3 = pnand %p1010_p2, %p1009_p1 }
  0x45   : > { %p1016_p12 = por %p1015_p8, %p1014_p6 }
  0x46   : > { %p1012_p4 = pneg %p1011_p3 }
  0x48   : > { %p1017_p5 = pnand %p1016_p12, %p1012_p4 }
  0x4a   : > { %1020 = shalt.err (!%p1017_p5)
}
  0x4b   : > { %s1021_s30 = scalar_lea.vmem %s203_s10, 256  ;;  %s1115_s28 = smov [#allocation3]  }
  0x4c   : > { %p1022_p7 = scmp.ne.s32.totalorder %s203_s10, %s1021_s30  ;;  %s1026_s6 = sshll.u32 %s1115_s28, 4  ;;  %s1027_s6 = int_to_ptr.vmem [resolvable:$false] %s1026_s6 }
  0x4d   : > { %s1028_s7 = scalar_lea.vmem %s1027_s6, 512  ;;  %p1029_p0 = scmp.lt.s32.totalorder %s203_s10, %s1027_s6 }
  0x4e   : > { %p1024_p10 = pnand %p1022_p7, %p1010_p2  ;;  %p1030_p1 = scmp.lt.s32.totalorder %s1028_s7, %s1021_s30 }
  0x50   : > { %p1025_p13 = pneg %p1024_p10  ;;  %p1031_p3 = por %p1030_p1, %p1029_p0 }
  0x52   : > { %p1032_p9 = pnand %p1031_p3, %p1025_p13 }
  0x54   : > { %1035 = shalt.err (!%p1032_p9)
}
  0x55   : > { %870 = dma.hbm_to_vmem [thread:$0]  (!%p1264_p11), %s1262_s8, 256, %s203_s10, %s191_s12  }
  0x56   : > { %p1586_p4 = scmp.ne.s32.totalorder %s1581_s23, 0 }
  0x57   : > { %s1285_s9 = sand.u32 (!%p1586_p4), 1, %s1100_s16   ;;  %p1587_p2 = scmp.ne.s32.totalorder (!%p1586_p4), %s1579_s21, 0 }
  0x58   : > { %211 = sbr.rel (%p1586_p4) target bundleno = 806 (0x326), region = 36  ;;  %s823_s13 = sshll.u32 (!%p1586_p4), %s1285_s9, 4 }
  0x59   : > { %s214_s14 = scalar_lea.sflag (!%p1586_p4), [#allocation4], %s1285_s9  ;;  %s217_s20 = scalar_lea.vmem (!%p1586_p4), [#allocation3], %s823_s13 }
  0x5d   : > { %1079 = dma.done.wait (%p1587_p2), %s214_s14, 256  }
  0x5e   : > { %1081 = vsyncadd (%p1587_p2), %s214_s14, 4294967040  ;;  %p1588_p9 = scmp.eq.s32.totalorder %s1173_s19, 0 }
  0x60   : > { %1083 = dma.done.wait (%p1588_p9), [#allocation7], 256   ;;  %p1589_p11 = pmov %p1588_p9 }
  0x61   : > { %p1590_p6 = pmov %p1588_p9 }
  0x62   : > { %1085 = vsyncadd (%p1589_p11), [#allocation7], 4294967040 }
  0x63   : > { %1087 = dma.done.wait (%p1590_p6), [#allocation10], 512   ;;  %p1591_p8 = pmov %p1590_p6 }
  0x64   : > { %v260_v0 = vlaneseq  ;;  %v1116_v2 = vmov 1.0   ;;  %v1306_v3 = vld [vmem:[%s217_s20] sm:$0xff]  ;;  %s1117_s21 = smov 112   ;;  %s1118_s23 = smov 111   ;;  %v1312_v4 = vld [vmem:[%s217_s20 + $0x8] sm:$0xff]  ;;  %v1122_v5 = vmov 0.0  }
  0x65   : > { %1089 = vsyncadd (%p1591_p8), [#allocation10], 4294966784  ;;  %384 = vrot.lane.b32.xlu1 %v1306_v3, %s1117_s21  ;;  %403 = vrot.lane.b32.xlu0 %v1306_v3, %s1118_s23  ;;  %s1119_s8 = smov 113   ;;  %s1120_s10 = smov 127   ;;  %v258_v8 = vld [vmem:[#allocation9 + $0x10] sm:$0xff]  ;;  %v259_v9 = vld [vmem:[#allocation9 + $0x18] sm:$0xff] }
  0x66   : > { %v1303_v1 = vshrl.u32 %v260_v0, 7  ;;  %s1121_s11 = smov 1   ;;  %511 = vmatprep.mubr.f32.mxu0 %v1122_v5  ;;  %690 = vmatprep.mubr.f32.mxu1 %v1122_v5  ;;  %s1123_s12 = smov 15   ;;  %v1342_v6 = vand.u32 127, %v260_v0  ;;  %v1348_v13 = vld [vmem:[#allocation9] sm:$0xff]  ;;  %v1350_v14 = vld [vmem:[#allocation9 + $0x8] sm:$0xff] }
  0x67   : > { %s1124_s25 = smov 16   ;;  %s1125_s26 = smov 17   ;;  %vm443_vm9 = vcmask 654336  }
  0x68   : > { %vm262_vm0 = vcmp.eq.s32.totalorder %v1303_v1, 0  ;;  %v1345_v7 = vsub.s32 0, %v1303_v1  ;;  %v393_v12 = vsub.s32 7, %v1303_v1  ;;  %v374_v15 = vsub.s32 6, %v1303_v1  ;;  %s836_s5 = sshll.u32 %s1173_s19, 8  ;;  %s253_s30 = scalar_lea.vmem [#allocation11], %s823_s13 }
  0x69   : > { %837 = vmatprep.subr.msk.mxu0 %vm262_vm0, %v1116_v2  ;;  %839 = vmatprep.subr.msk.mxu1 %vm262_vm0, %v1116_v2  ;;  %vm388_vm1 = vcmp.lt.s32.totalorder %v1342_v6, 112  ;;  %vm407_vm2 = vcmp.lt.s32.totalorder %v1342_v6, 111  ;;  %vm369_vm3 = vcmp.lt.s32.totalorder %v1342_v6, 113  ;;  %v355_v22 = vsub.s32 5, %v1303_v1  ;;  %s714_s28 = sshll.u32 %s253_s30, 4  ;;  %s712_s14 = scalar_lea.hbm %s1574_s4, %s836_s5  ;;  %s715_s28 = int_to_ptr.vmem [resolvable:$true] %s714_s28 }
  0x6a   : > { %838 = vmatpush1.msk.msra.mxu0 %vm262_vm0, %v1116_v2  ;;  %840 = vmatpush1.msk.msra.mxu1 %vm262_vm0, %v1116_v2  ;;  %v1356_v16 = vrot.slane %v258_v8, %v1345_v7  ;;  %v1359_v17 = vrot.slane %v259_v9, %v1345_v7  ;;  %v1362_v18 = vrot.slane %v1348_v13, %v393_v12  ;;  %vm350_vm4 = vcmp.lt.s32.totalorder %v1342_v6, 127  ;;  %s700_s20 = scalar_lea.sflag [#allocation5], %s1285_s9  ;;  %p1592_p5 = scmp.ne.s32.totalorder %s1584_s29, 0 }
  0x6b   : > { %386 = vrot.lane.b32.xlu1 %v1312_v4, %s1117_s21  ;;  %405 = vrot.lane.b32.xlu0 %v1312_v4, %s1118_s23  ;;  %v1365_v19 = vrot.slane %v1350_v14, %v393_v12  ;;  %v1376_v26 = vrot.slane %v1348_v13, %v374_v15  ;;  %v1383_v30 = vrot.slane %v1350_v14, %v374_v15  ;;  %v334_v41 = vsub.s32 3, %v1303_v1  ;;  %s1126_s19 = smov [#allocation11]  }
  0x6c   : > { %v1393_v37 = vrot.slane %v1348_v13, %v355_v22  ;;  %v1398_v40 = vrot.slane %v1350_v14, %v355_v22  ;;  %vm329_vm5 = vcmp.lt.s32.totalorder %v1342_v6, 1  ;;  %v315_v46 = vsub.s32 2, %v1303_v1  ;;  %s1040_s13 = sshll.u32 %s1126_s19, 4  ;;  %s1041_s13 = int_to_ptr.vmem [resolvable:$false] %s1040_s13 }
  0x6d   : > { %v1410_v49 = vrot.slane %v1348_v13, %v334_v41  ;;  %v1413_v50 = vrot.slane %v1350_v14, %v334_v41  ;;  %vm310_vm6 = vcmp.lt.s32.totalorder %v1342_v6, 15  ;;  %v296_v59 = vsub.s32 1, %v1303_v1  ;;  %p1043_p13 = scmp.lt.s32.totalorder %s715_s28, %s1041_s13 }
  0x6e   : > { %v1421_v55 = vrot.slane %v1348_v13, %v315_v46  ;;  %v1427_v58 = vrot.slane %v1350_v14, %v315_v46  ;;  %vm291_vm7 = vcmp.lt.s32.totalorder %v1342_v6, 16  ;;  %vm272_vm8 = vcmp.lt.s32.totalorder %v1342_v6, 17 }
  0x6f   : > { %367 = vrot.lane.b32.xlu1 %v1312_v4, %s1119_s8  ;;  %365 = vrot.lane.b32.xlu0 %v1306_v3, %s1119_s8  ;;  %v1439_v1 = vrot.slane %v1348_v13, %v296_v59  ;;  %v1442_v5 = vrot.slane %v1350_v14, %v296_v59 }
  0x73   : > { %348 = vrot.lane.b32.xlu1 %v1312_v4, %s1120_s10  ;;  %346 = vrot.lane.b32.xlu0 %v1306_v3, %s1120_s10 }
  0x77   : > { %327 = vrot.lane.b32.xlu1 %v1312_v4, %s1121_s11  ;;  %325 = vrot.lane.b32.xlu0 %v1306_v3, %s1121_s11 }
  0x7b   : > { %308 = vrot.lane.b32.xlu1 %v1312_v4, %s1123_s12  ;;  %306 = vrot.lane.b32.xlu0 %v1306_v3, %s1123_s12 }
  0x7f   : > { %289 = vrot.lane.b32.xlu1 %v1312_v4, %s1124_s25  ;;  %287 = vrot.lane.b32.xlu0 %v1306_v3, %s1124_s25 }
  0x83   : > { %268 = vrot.lane.b32.xlu1 %v1312_v4, %s1125_s26  ;;  %266 = vrot.lane.b32.xlu0 %v1306_v3, %s1125_s26 }
  0xd7   : > { %v385_v10 = vpop.permute.xlu1 %384  ;;  %v404_v11 = vpop.permute.xlu0 %403 }
  0xdd   : > { %v387_v20 = vpop.permute.xlu1 %386  ;;  %v406_v21 = vpop.permute.xlu0 %405 }
  0xde   : > { %v390_v23 = vsel %vm388_vm1, %v387_v20, %v385_v10  ;;  %v408_v24 = vsel %vm407_vm2, %v404_v11, %v406_v21  ;;  %v409_v25 = vsel %vm407_vm2, %v406_v21, %v404_v11  ;;  %v389_v27 = vsel %vm388_vm1, %v385_v10, %v387_v20 }
  0xdf   : > { %v418_v28 = vmul.f32 %v1356_v16, %v408_v24  ;;  %v419_v29 = vmul.f32 %v1359_v17, %v409_v25  ;;  %v400_v31 = vmul.f32 %v1365_v19, %v390_v23  ;;  %v399_v34 = vmul.f32 %v1362_v18, %v389_v27 }
  0xe0   : > { %v1453_v20 = vrot.slane %v1348_v13, %v1345_v7  ;;  %v1457_v21 = vrot.slane %v1350_v14, %v1345_v7  ;;  %v422_v13 = vld [vmem:[#allocation6] sm:$0xff] }
  0xe1   : > { %v368_v32 = vpop.permute.xlu1 %367  ;;  %461 = vmatprep.subr.mxu0 %v419_v29  ;;  %v366_v33 = vpop.permute.xlu0 %365 }
  0xe2   : > { %v370_v35 = vsel %vm369_vm3, %v366_v33, %v368_v32  ;;  %v371_v36 = vsel %vm369_vm3, %v368_v32, %v366_v33  ;;  %462 = vmatpush1.msra.mxu0 %v418_v28 }
  0xe3   : > { %v380_v38 = vmul.f32 %v1376_v26, %v370_v35  ;;  %v381_v39 = vmul.f32 %v1383_v30, %v371_v36  ;;  %463 = vmatprep.subr.mxu0 %v400_v31 }
  0xe4   : > { %464 = vmatpush1.msra.mxu0 %v399_v34 }
  0xe5   : > { %v349_v42 = vpop.permute.xlu1 %348  ;;  %465 = vmatprep.subr.mxu0 %v381_v39  ;;  %v347_v43 = vpop.permute.xlu0 %346 }
  0xe6   : > { %v351_v44 = vsel %vm350_vm4, %v347_v43, %v349_v42  ;;  %v352_v45 = vsel %vm350_vm4, %v349_v42, %v347_v43  ;;  %466 = vmatpush1.msra.mxu0 %v380_v38 }
  0xe7   : > { %v361_v47 = vmul.f32 %v1393_v37, %v351_v44  ;;  %v362_v48 = vmul.f32 %v1398_v40, %v352_v45 }
  0xe9   : > { %v328_v51 = vpop.permute.xlu1 %327  ;;  %467 = vmatprep.subr.mxu0 %v362_v48  ;;  %v326_v52 = vpop.permute.xlu0 %325 }
  0xea   : > { %v330_v53 = vsel %vm329_vm5, %v326_v52, %v328_v51  ;;  %v331_v54 = vsel %vm329_vm5, %v328_v51, %v326_v52  ;;  %468 = vmatpush1.msra.mxu0 %v361_v47 }
  0xeb   : > { %v340_v56 = vmul.f32 %v1410_v49, %v331_v54  ;;  %v341_v57 = vmul.f32 %v1413_v50, %v330_v53  ;;  %469 = vmatprep.subr.mxu0 %v1312_v4 }
  0xec   : > { %470 = vmatpush1.msra.mxu0 %v1306_v3 }
  0xed   : > { %v309_v60 = vpop.permute.xlu1 %308  ;;  %471 = vmatprep.subr.mxu0 %v341_v57  ;;  %v307_v61 = vpop.permute.xlu0 %306 }
  0xee   : > { %v311_v62 = vsel %vm310_vm6, %v307_v61, %v309_v60  ;;  %v312_v63 = vsel %vm310_vm6, %v309_v60, %v307_v61  ;;  %472 = vmatpush1.msra.mxu0 %v340_v56 }
  0xef   : > { %v321_v0 = vmul.f32 %v1421_v55, %v312_v63  ;;  %v322_v2 = vmul.f32 %v1427_v58, %v311_v62 }
  0xf1   : > { %v290_v8 = vpop.permute.xlu1 %289  ;;  %473 = vmatprep.subr.mxu0 %v322_v2  ;;  %v288_v9 = vpop.permute.xlu0 %287 }
  0xf2   : > { %v292_v10 = vsel %vm291_vm7, %v288_v9, %v290_v8  ;;  %v293_v11 = vsel %vm291_vm7, %v290_v8, %v288_v9  ;;  %474 = vmatpush1.msra.mxu0 %v321_v0 }
  0xf3   : > { %v302_v12 = vmul.f32 %v1439_v1, %v293_v11  ;;  %v303_v15 = vmul.f32 %v1442_v5, %v292_v10 }
  0xf5   : > { %v269_v22 = vpop.permute.xlu1 %268  ;;  %475 = vmatprep.subr.mxu0 %v303_v15  ;;  %v267_v23 = vpop.permute.xlu0 %266 }
  0xf6   : > { %v273_v24 = vsel %vm272_vm8, %v267_v23, %v269_v22  ;;  %v274_v25 = vsel %vm272_vm8, %v269_v22, %v267_v23  ;;  %476 = vmatpush1.msra.mxu0 %v302_v12 }
  0xf7   : > { %v283_v27 = vmul.f32 %v1453_v20, %v274_v25  ;;  %v284_v28 = vmul.f32 %v1457_v21, %v273_v24  ;;  %v602_v24 = vld [vmem:[#allocation8] sm:$0xff] }
  0xf9   : > { %477 = vmatprep.subr.mxu0 %v284_v28 }
  0xfa   : > { %478 = vmatpush1.msra.mxu0 %v283_v27 }
  0xfb   : > { %828 = vmatmul.mubr.msk.f32.vlgmr.msra.gmra.mxu0 %vm443_vm9, %v422_v13 }
 0x1bb   : > { %v513_v7 = vpop.f32.mrf.mxu0 }
 0x1bc   : > { %v518_v14 = vmax.f32 %v513_v7, 0.0 }
 0x1bd   : > { %v515_v29 = vpop.f32.mrf.mxu0 }
 0x1be   : > { %v519_v31 = vmax.f32 %v515_v29, 0.0  ;;  %592 = vrot.lane.b32.xlu0 %v518_v14, %s1118_s23 }
 0x1c0   : > { %594 = vrot.lane.b32.xlu1 %v519_v31, %s1118_s23  ;;  %s1042_s23 = scalar_lea.vmem %s1041_s13, 512 }
 0x1c2   : > { %582 = vrot.lane.b32.xlu0 %v518_v14, %s1117_s21 }
 0x1c4   : > { %584 = vrot.lane.b32.xlu1 %v519_v31, %s1117_s21  ;;  %s1036_s21 = scalar_lea.vmem %s715_s28, 256 }
 0x1c5   : > { %p1037_p12 = scmp.ne.s32.totalorder %s715_s28, %s1036_s21  ;;  %p1044_p0 = scmp.lt.s32.totalorder %s1042_s23, %s1036_s21 }
 0x1c6   : > { %572 = vrot.lane.b32.xlu0 %v518_v14, %s1119_s8 }
 0x1c7   : > { %p1038_p7 = pnand %p1037_p12, %p1592_p5  ;;  %p1045_p1 = por %p1044_p0, %p1043_p13 }
 0x1c8   : > { %574 = vrot.lane.b32.xlu1 %v519_v31, %s1119_s8 }
 0x1c9   : > { %p1039_p10 = pneg %p1038_p7 }
 0x1ca   : > { %562 = vrot.lane.b32.xlu0 %v518_v14, %s1120_s10 }
 0x1cb   : > { %p1046_p3 = pnand %p1045_p1, %p1039_p10 }
 0x1cc   : > { %564 = vrot.lane.b32.xlu1 %v519_v31, %s1120_s10 }
 0x1ce   : > { %550 = vrot.lane.b32.xlu0 %v518_v14, %s1121_s11 }
 0x1d0   : > { %552 = vrot.lane.b32.xlu1 %v519_v31, %s1121_s11 }
 0x1d2   : > { %540 = vrot.lane.b32.xlu0 %v518_v14, %s1123_s12 }
 0x1d4   : > { %542 = vrot.lane.b32.xlu1 %v519_v31, %s1123_s12 }
 0x1d6   : > { %530 = vrot.lane.b32.xlu0 %v518_v14, %s1124_s25 }
 0x1d8   : > { %532 = vrot.lane.b32.xlu1 %v519_v31, %s1124_s25 }
 0x1da   : > { %520 = vrot.lane.b32.xlu0 %v518_v14, %s1125_s26 }
 0x1dc   : > { %522 = vrot.lane.b32.xlu1 %v519_v31, %s1125_s26 }
 0x230   : > { %v593_v32 = vpop.permute.xlu0 %592 }
 0x232   : > { %v595_v33 = vpop.permute.xlu1 %594 }
 0x233   : > { %v596_v34 = vsel %vm407_vm2, %v593_v32, %v595_v33  ;;  %v597_v35 = vsel %vm407_vm2, %v595_v33, %v593_v32 }
 0x234   : > { %v598_v36 = vmul.f32 %v596_v34, %v1356_v16  ;;  %v599_v38 = vmul.f32 %v597_v35, %v1359_v17  ;;  %v583_v39 = vpop.permute.xlu0 %582 }
 0x236   : > { %640 = vmatprep.subr.mxu1 %v599_v38  ;;  %v585_v41 = vpop.permute.xlu1 %584 }
 0x237   : > { %v586_v42 = vsel %vm388_vm1, %v583_v39, %v585_v41  ;;  %v587_v43 = vsel %vm388_vm1, %v585_v41, %v583_v39  ;;  %641 = vmatpush1.msra.mxu1 %v598_v36 }
 0x238   : > { %v588_v44 = vmul.f32 %v586_v42, %v1362_v18  ;;  %v589_v45 = vmul.f32 %v587_v43, %v1365_v19  ;;  %v573_v46 = vpop.permute.xlu0 %572 }
 0x23a   : > { %642 = vmatprep.subr.mxu1 %v589_v45  ;;  %v575_v47 = vpop.permute.xlu1 %574 }
 0x23b   : > { %v576_v16 = vsel %vm369_vm3, %v573_v46, %v575_v47  ;;  %v577_v17 = vsel %vm369_vm3, %v575_v47, %v573_v46  ;;  %643 = vmatpush1.msra.mxu1 %v588_v44 }
 0x23c   : > { %v578_v48 = vmul.f32 %v576_v16, %v1376_v26  ;;  %v579_v51 = vmul.f32 %v577_v17, %v1383_v30  ;;  %v563_v52 = vpop.permute.xlu0 %562 }
 0x23e   : > { %644 = vmatprep.subr.mxu1 %v579_v51  ;;  %v565_v53 = vpop.permute.xlu1 %564 }
 0x23f   : > { %v566_v18 = vsel %vm350_vm4, %v563_v52, %v565_v53  ;;  %v567_v19 = vsel %vm350_vm4, %v565_v53, %v563_v52  ;;  %645 = vmatpush1.msra.mxu1 %v578_v48 }
 0x240   : > { %v568_v54 = vmul.f32 %v566_v18, %v1393_v37  ;;  %v569_v56 = vmul.f32 %v567_v19, %v1398_v40  ;;  %v551_v57 = vpop.permute.xlu0 %550 }
 0x242   : > { %646 = vmatprep.subr.mxu1 %v569_v56  ;;  %v553_v59 = vpop.permute.xlu1 %552 }
 0x243   : > { %v554_v26 = vsel %vm329_vm5, %v551_v57, %v553_v59  ;;  %v555_v30 = vsel %vm329_vm5, %v553_v59, %v551_v57  ;;  %647 = vmatpush1.msra.mxu1 %v568_v54 }
 0x244   : > { %v556_v60 = vmul.f32 %v555_v30, %v1410_v49  ;;  %v557_v61 = vmul.f32 %v554_v26, %v1413_v50  ;;  %v541_v62 = vpop.permute.xlu0 %540  ;;  %648 = vmatprep.subr.mxu1 %v519_v31 }
 0x245   : > { %649 = vmatpush1.msra.mxu1 %v518_v14 }
 0x246   : > { %650 = vmatprep.subr.mxu1 %v557_v61  ;;  %v543_v37 = vpop.permute.xlu1 %542 }
 0x247   : > { %v544_v40 = vsel %vm310_vm6, %v541_v62, %v543_v37  ;;  %v545_v63 = vsel %vm310_vm6, %v543_v37, %v541_v62  ;;  %651 = vmatpush1.msra.mxu1 %v556_v60 }
 0x248   : > { %v546_v0 = vmul.f32 %v545_v63, %v1421_v55  ;;  %v547_v2 = vmul.f32 %v544_v40, %v1427_v58  ;;  %v531_v8 = vpop.permute.xlu0 %530 }
 0x24a   : > { %652 = vmatprep.subr.mxu1 %v547_v2  ;;  %v533_v49 = vpop.permute.xlu1 %532 }
 0x24b   : > { %v534_v50 = vsel %vm291_vm7, %v531_v8, %v533_v49  ;;  %v535_v9 = vsel %vm291_vm7, %v533_v49, %v531_v8  ;;  %653 = vmatpush1.msra.mxu1 %v546_v0 }
 0x24c   : > { %v536_v10 = vmul.f32 %v535_v9, %v1439_v1  ;;  %v537_v11 = vmul.f32 %v534_v50, %v1442_v5  ;;  %v521_v12 = vpop.permute.xlu0 %520 }
 0x24e   : > { %654 = vmatprep.subr.mxu1 %v537_v11  ;;  %v523_v55 = vpop.permute.xlu1 %522 }
 0x24f   : > { %v524_v58 = vsel %vm272_vm8, %v521_v12, %v523_v55  ;;  %v525_v15 = vsel %vm272_vm8, %v523_v55, %v521_v12  ;;  %655 = vmatpush1.msra.mxu1 %v536_v10 }
 0x250   : > { %v526_v22 = vmul.f32 %v525_v15, %v1453_v20  ;;  %v527_v23 = vmul.f32 %v524_v58, %v1457_v21 }
 0x252   : > { %656 = vmatprep.subr.mxu1 %v527_v23 }
 0x253   : > { %657 = vmatpush1.msra.mxu1 %v526_v22 }
 0x254   : > { %829 = vmatmul.mubr.msk.f32.vlgmr.msra.gmra.mxu1 %vm443_vm9, %v602_v24 }
 0x314   : > { %v692_v1 = vpop.f32.mrf.mxu1 }
 0x315   : > { %v693_v6 = vadd.f32 %v692_v1, %v1306_v3 }
 0x316   : > { %v694_v5 = vpop.f32.mrf.mxu1 }
 0x317   : > { %697 = vst [vmem:[%s253_s30] sm:$0xff] %v693_v6  ;;  %v695_v20 = vadd.f32 %v694_v5, %v1312_v4 }
 0x319   : > { %698 = vst [vmem:[%s253_s30 + $0x8] sm:$0xff] %v695_v20 }
 0x31a   : > { %1049 = shalt.err (!%p1046_p3)
}
 0x31b   : > { %s1050_s8 = scalar_lea.hbm %s712_s14, 256  ;;  %s1054_s11 = scalar_lea.hbm %s1574_s4, 512 }
 0x31c   : > { %p1051_p4 = scmp.ne.s32.totalorder %s712_s14, %s1050_s8  ;;  %p1055_p11 = scmp.lt.s32.totalorder %s712_s14, %s1574_s4 }
 0x31d   : > { %p1056_p6 = scmp.lt.s32.totalorder %s1054_s11, %s1050_s8 }
 0x31e   : > { %p1052_p2 = pnand %p1051_p4, %p1592_p5 }
 0x31f   : > { %p1057_p8 = por %p1056_p6, %p1055_p11 }
 0x320   : > { %p1053_p9 = pneg %p1052_p2 }
 0x322   : > { %p1058_p12 = pnand %p1057_p8, %p1053_p9 }
 0x324   : > { %1061 = shalt.err (!%p1058_p12)
}
 0x325   : > { %855 = dma.vmem_to_hbm [thread:$0]  (%p1592_p5), %s715_s28, 256, %s712_s14, %s700_s20  }
 0x326 PF: > { %s726_s26 = sand.u32 1, %s1096_s15   ;;  %p1593_p7 = scmp.ne.s32.totalorder %s1580_s22, 0 }
 0x327   : > { %p1594_p10 = scmp.ge.s32.totalorder %s1108_s18, 2  ;;  %s727_s5 = scalar_lea.sflag [#allocation5], %s726_s26 }
 0x329   : > { %p872_p13 = pnand %p1594_p10, %p1593_p7 }
 0x32b   : > { %p873_p0 = pneg %p872_p13 }
 0x32d   : > { %1091 = dma.done.wait (%p873_p0), %s727_s5, 256  }
 0x32e   : > { %1093 = vsyncadd (%p873_p0), %s727_s5, 4294967040  ;;  %p19_p1 = scmp.ge.s32.totalorder %s1239_s24, 4   ;;  %s1595_s15 = smov %s1100_s16 }
 0x32f   : > { %s1596_s16 = smov %s1104_s17  ;;  %s1597_s17 = smov %s1249_s27 }
 0x330   : > { %s1598_s18 = smov %s1239_s24  ;;  %21 = sbr.rel (!%p19_p1) target bundleno = 7 (0x7), region = 93 }
 0x335   :  { %732 = vsyncpa [#allocation4], 1 }
 0x336   :  { %734 = vsyncpa [#allocation4 + $0x1], 1 }
 0x337   :  { %735 = vsyncpa [#allocation7], 1 }
 0x338   :  { %736 = vsyncpa [#allocation10], 1 }
 0x339   :  { %737 = vsyncpa [#allocation5], 1 }
 0x33a   :  { %739 = vsyncpa [#allocation5 + $0x1], 1 }

</bundles_post_ra>
